<compile_context>
chip_gen: v7x
topology: tpu7x:2x2x1
jax: 0.10.0
libtpu: 0.0.40
codegen_flags: <defaults>
</compile_context>

<pallas_src>
import functools

import jax
import jax.numpy as jnp
import numpy as np
from jax.experimental import pallas as pl
from jax.experimental.pallas import tpu as pltpu


# ---------------------------------------------------------------------------
# Fused Pallas kernel (one grid step = one batch tile [x one output-row tile])
# ---------------------------------------------------------------------------
def _softmask_kernel(*refs, mode, has_mask, d2, ti):
    if mode == 'ir':
        if has_mask:
            x_ref, m_ref, o_ref, mag_scr = refs
        else:
            x_ref, o_ref, mag_scr = refs
            m_ref = None
    else:
        mag_scr = None
        if has_mask:
            x_ref, m_ref, o_ref = refs
        else:
            x_ref, o_ref = refs
            m_ref = None

    if mode == 'c':
        # f32 accumulation regardless of the input dtype.
        s1 = jnp.sum(x_ref[...], axis=1, dtype=jnp.float32)              # (bt, D2)
        y = s1 / jnp.sum(s1, axis=1, keepdims=True)                      # (bt, D2)
    elif mode == 'ir1d':
        mag = jnp.sum(x_ref[...], axis=1, dtype=jnp.float32) * 0.001     # (bt, D2)
        y = jnp.clip(mag, -1.0, 1.0)
    elif mode == 'ir':
        i = pl.program_id(1)

        # mag is computed once per batch tile (the x block stays resident across the
        # row-tile axis) and reused for every output row tile.
        @pl.when(i == 0)
        def _():
            mag = jnp.sum(x_ref[...], axis=1, dtype=jnp.float32) * 0.001  # (bt, d2)
            if mag_scr.shape[1] == d2:
                mag_scr[...] = mag
            else:                          # scratch padded to ni * ti columns
                mag_scr[...] = jnp.zeros_like(mag_scr)
                mag_scr[:, :d2] = mag

        start = i * ti
        if ti % 8 == 0:
            start = pl.multiple_of(start, 8)
        rows = mag_scr[:, pl.ds(start, ti)]                               # (bt, ti)
        cols = mag_scr[:, :d2]                                            # (bt, d2)
        # TODO(synk): rows' lane->sublane relayout is re-done per row tile; it is tiny
        # next to the (bt, ti, d2) output stream (free XLU slack on all generations).
        y = jnp.clip(rows[:, :, None] * cols[:, None, :], -1.0, 1.0)      # (bt, ti, d2)
    else:  # mode == '': identity (the kernel is only invoked when a mask is applied)
        y = x_ref[...]

    y = y.reshape(o_ref.shape)
    if m_ref is not None:
        y = jnp.where(m_ref[...] != 0, y, jnp.zeros_like(y))
    o_ref[...] = y.astype(o_ref.dtype)


# ---------------------------------------------------------------------------
# Tiling heuristics
# ---------------------------------------------------------------------------
_TARGET_BLOCK = 6 << 20   # ~6 MiB per grid step: amortizes the ~0.35 us/step cost
_MIN_BLOCK = 1 << 20      # never shrink a block below ~1 MiB just to add steps
_MIN_STEPS = 4            # >= 2 steps per TensorCore on v7x (2 TCs); harmless on v5e/v6e
_VMEM_CAP = 48 << 20      # leaves headroom under v7x's 64 MiB physical VMEM


def _pick_bt(B, per_b_bytes, ni=1):
    """Batch tile: as big as the target block allows, then shrunk (never below
    ~_MIN_BLOCK per block) until there are >= _MIN_STEPS total grid steps."""
    bt = max(1, min(B, _TARGET_BLOCK // max(per_b_bytes, 1)))
    while (pl.cdiv(B, bt) * ni < _MIN_STEPS and bt > 1
           and max(1, bt // 2) * per_b_bytes >= _MIN_BLOCK):
        bt = max(1, bt // 2)
    return bt


def _align_sublane(bt, n, granule=32):
    """A block's second-minor dim must be a multiple of the layout granule or span the
    full axis (granule 32 covers f32 / bf16 outputs and int8 masks alike)."""
    if bt >= n:
        return n
    if bt % granule == 0:
        return bt
    return (bt // granule) * granule if bt > granule else min(n, granule)


def _prep_mask(mask, target_shape):
    """Mask as a 1-byte int8 stream in the kernel-output shape (never int32; no
    broadcast pass when the caller already supplies an output-shaped mask)."""
    m = jnp.asarray(mask)
    if m.shape != tuple(target_shape):
        # TODO(synk): broadcast-aware mask BlockSpecs; for now non-output-shaped masks
        # fall back to one (cheap, 1-byte) materialized broadcast.
        m = jnp.broadcast_to(m, target_shape)
    if m.dtype != jnp.int8:
        m = m.astype(jnp.int8)
    return m


# ---------------------------------------------------------------------------
# Wrapper
# ---------------------------------------------------------------------------
def soft_mask(x, mask=None, mode='', *, batch_tile=None, ir_row_tile=None):
    """Pallas-fused forward of the PyTorch SoftMask module (rank-3 inputs)."""
    if mode not in ('', 'c', 'ir', 'ir1d'):
        raise ValueError(f"unknown mode {mode!r}")
    x = jnp.asarray(x)
    if x.ndim != 3:
        # TODO(synk): the reference module is shape-agnostic; only the canonical
        # rank-3 [B, D1, D2] usage is implemented here.
        raise NotImplementedError("soft_mask expects a rank-3 input [B, D1, D2]")
    if mode == '' and mask is None:
        return x                                       # pure pass-through

    B, D1, D2 = x.shape
    dtype = x.dtype
    itemsize = jnp.dtype(dtype).itemsize
    has_mask = mask is not None
    m_bpe = 1 if has_mask else 0                       # int8 mask bytes / output element

    scratch_shapes = []
    reshape_out = None
    ti = None
    args = [x]

    if mode == 'ir':
        # Row-tile the (D2, D2) output so one step's write block stays ~<= 3 MiB
        # (bounds VMEM on v7x and keeps the write stream lane-dense and pipelined).
        ti = (ir_row_tile if ir_row_tile is not None
              else max(1, (_TARGET_BLOCK // 2) // max(D2 * (itemsize + m_bpe), 1)))
        ti = min(ti, D2)
        if ti < D2:
            ti = max(32, (ti // 32) * 32)              # 32: valid sublane granule for
            if ti >= D2:                               # f32/bf16 outputs and int8 masks
                ti = D2
        ni = pl.cdiv(D2, ti)

        per_b = D1 * D2 * itemsize + ti * D2 * (itemsize + m_bpe)
        bt = min(B, batch_tile) if batch_tile else _pick_bt(B, per_b, ni=ni)
        nb = pl.cdiv(B, bt)

        grid = (nb, ni)
        dims = ("parallel", "arbitrary")               # row axis reuses the mag scratch
        in_specs = [pl.BlockSpec((bt, D1, D2), lambda b, i: (b, 0, 0))]
        if has_mask:
            args.append(_prep_mask(mask, (B, D2, D2)))
            in_specs.append(pl.BlockSpec((bt, ti, D2), lambda b, i: (b, i, 0)))
        out_specs = pl.BlockSpec((bt, ti, D2), lambda b, i: (b, i, 0))
        out_shape = jax.ShapeDtypeStruct((B, D2, D2), dtype)
        scratch_shapes = [pltpu.VMEM((bt, int(ni * ti)), jnp.float32)]
        step_bytes = bt * per_b + bt * int(ni * ti) * 4
        out_elems = B * D2 * D2

    elif mode in ('c', 'ir1d'):
        per_b = D1 * D2 * itemsize + D2 * (itemsize + m_bpe)
        bt = min(B, batch_tile) if batch_tile else _pick_bt(B, per_b)
        bt_al = _align_sublane(bt, B)
        # Dense 2-D (B, D2) output (batch on sublanes) needs an aligned batch tile;
        # fall back to a (B, 1, D2)-layout block if aligning would blow the budget.
        use_2d = bt_al * per_b <= 4 * _TARGET_BLOCK
        if use_2d:
            bt = bt_al
        nb = pl.cdiv(B, bt)
        grid = (nb,)
        dims = ("parallel",)
        in_specs = [pl.BlockSpec((bt, D1, D2), lambda b: (b, 0, 0))]
        if use_2d:
            out_shape = jax.ShapeDtypeStruct((B, D2), dtype)
            out_specs = pl.BlockSpec((bt, D2), lambda b: (b, 0))
            mask_spec = pl.BlockSpec((bt, D2), lambda b: (b, 0))
        else:
            out_shape = jax.ShapeDtypeStruct((B, 1, D2), dtype)
            out_specs = pl.BlockSpec((bt, 1, D2), lambda b: (b, 0, 0))
            mask_spec = pl.BlockSpec((bt, 1, D2), lambda b: (b, 0, 0))
            reshape_out = (B, D2)
        if has_mask:
            m = _prep_mask(mask, (B, D2))
            if not use_2d:
                m = m.reshape(B, 1, D2)
            args.append(m)
            in_specs.append(mask_spec)
        step_bytes = bt * per_b
        out_elems = B * D2

    else:  # mode == '' with a mask: masked pass-through
        per_b = D1 * D2 * (2 * itemsize + m_bpe)
        bt = min(B, batch_tile) if batch_tile else _pick_bt(B, per_b)
        nb = pl.cdiv(B, bt)
        grid = (nb,)
        dims = ("parallel",)
        in_specs = [pl.BlockSpec((bt, D1, D2), lambda b: (b, 0, 0))]
        args.append(_prep_mask(mask, (B, D1, D2)))
        in_specs.append(pl.BlockSpec((bt, D1, D2), lambda b: (b, 0, 0)))
        out_specs = pl.BlockSpec((bt, D1, D2), lambda b: (b, 0, 0))
        out_shape = jax.ShapeDtypeStruct((B, D1, D2), dtype)
        step_bytes = bt * per_b
        out_elems = B * D1 * D2

    # VMEM limit: double-buffered step footprint + margin, capped for v7x (64 MiB phys).
    vmem_limit = int(min(_VMEM_CAP, max(16 << 20, 2 * step_bytes + (4 << 20))))

    bytes_accessed = B * D1 * D2 * itemsize + out_elems * itemsize + out_elems * m_bpe
    cost = pl.CostEstimate(flops=2 * B * D1 * D2 + 2 * out_elems,
                           transcendentals=0, bytes_accessed=int(bytes_accessed))

    kernel = functools.partial(_softmask_kernel, mode=mode, has_mask=has_mask,
                               d2=D2, ti=ti)
    out = pl.pallas_call(
        kernel,
        out_shape=out_shape,
        grid=grid,
        in_specs=in_specs,
        out_specs=out_specs,
        scratch_shapes=scratch_shapes,
        compiler_params=pltpu.CompilerParams(
            dimension_semantics=dims,
            vmem_limit_bytes=vmem_limit,
        ),
        cost_estimate=cost,
    )(*args)

    if reshape_out is not None:
        out = out.reshape(reshape_out)
    return out


class SoftMask:
    """JAX/Pallas port of the PyTorch SoftMask module (forward pass only)."""

    def __init__(self, dtype=jnp.float32):
        # `self.zero` of the reference is implicit (where(mask, x, 0) in x's dtype).
        self.dtype = dtype

    def __call__(self, x, mask=None, mode='', **tiling_overrides):
        return soft_mask(x, mask=mask, mode=mode, **tiling_overrides)


# ---------------------------------------------------------------------------
# Self-test vs a pure-numpy reference of the PyTorch forward
# ---------------------------------------------------------------------------
def _ref_softmask(x, mask=None, mode=''):
    x = np.asarray(jax.device_get(x)).astype(np.float64)
    if mode == 'c':
        x = x.sum(axis=1) / x.sum(axis=(1, 2))[..., None]
    if mode == 'ir':
        mag = x.sum(axis=1) * 0.001
        x = np.clip(mag[:, :, None] * mag[:, None, :], -1.0, 1.0)
    if mode == 'ir1d':
        mag = x.sum(axis=1) * 0.001
        x = np.clip(mag, -1.0, 1.0)
    if mask is not None:
        x = np.where(np.asarray(jax.device_get(mask)), x, 0.0)
    return x


def _check(mod, x, mask, mode, rtol=1e-5, atol=1e-6, **kw):
    out = jax.block_until_ready(mod(x, mask=mask, mode=mode, **kw))
    ref = _ref_softmask(x, mask=mask, mode=mode)
    assert out.shape == ref.shape, (mode, out.shape, ref.shape)
    out64 = np.asarray(jax.device_get(out)).astype(np.float64)
    np.testing.assert_allclose(out64, ref, rtol=rtol, atol=atol)


if __name__ == "__main__":
    k = jax.random.split(jax.random.PRNGKey(0), 10)
    mod = SoftMask()

    # canonical small shapes: x[B=2, D1=16, D2=16]
    B, N = 2, 16
    x = 200.0 * jax.random.normal(k[0], (B, N, N), dtype=jnp.float32)
    x_pos = jnp.abs(x) + 1.0                       # mode 'c' needs a nonzero denominator
    mask2d = jax.random.bernoulli(k[1], 0.7, (B, N))
    mask3d = jax.random.bernoulli(k[2], 0.7, (B, N, N))

    _check(mod, x, mask3d, '')
    _check(mod, x_pos, None, 'c')
    _check(mod, x_pos, mask2d, 'c')
    _check(mod, x, None, 'ir')
    _check(mod, x, mask3d, 'ir')
    _check(mod, x, None, 'ir1d')
    _check(mod, x, mask2d, 'ir1d')

    # ragged batch tiles + row-tiled 'ir' output (forced small tiles)
    x64 = 200.0 * jax.random.normal(k[3], (5, 8, 64), dtype=jnp.float32)
    m64 = jax.random.bernoulli(k[4], 0.6, (5, 64, 64))
    mfull = jax.random.bernoulli(k[5], 0.6, (5, 8, 64))
    _check(mod, x64, None, 'ir', batch_tile=2, ir_row_tile=32)
    _check(mod, x64, m64, 'ir', batch_tile=2, ir_row_tile=32)
    _check(mod, x64, mfull, '', batch_tile=2)

    # 'ir' where the row tile does not divide D2 (padded mag scratch, masked stores)
    x40 = 200.0 * jax.random.normal(k[6], (5, 8, 40), dtype=jnp.float32)
    m40 = jax.random.bernoulli(k[7], 0.6, (5, 40, 40))
    _check(mod, x40, m40, 'ir', batch_tile=2, ir_row_tile=32)

    # ragged, sublane-aligned batch tiling for the dense 2-D 'c' output
    xc = jnp.abs(200.0 * jax.random.normal(k[8], (40, 8, 16), dtype=jnp.float32)) + 1.0
    _check(mod, xc, None, 'c', batch_tile=32)

    # bf16 inputs (kernel accumulates the D1 reduction in f32)
    xb16 = x.astype(jnp.bfloat16)
    _check(mod, xb16, None, 'ir1d', rtol=2e-2, atol=2e-2)
    _check(mod, xb16, mask3d, 'ir', rtol=2e-2, atol=2e-2)

    # mode '' with no mask is a pure pass-through
    np.testing.assert_allclose(np.asarray(mod(x)), np.asarray(x))

    print("KERNEL_OK")
</pallas_src>

<mosaic_0001>
module attributes {stable_mosaic.version = 11 : i64} {
  func.func @_softmask_kernel(%arg0: i32, %arg1: memref<2x16x16xf32, #tpu.memory_space<vmem>>, %arg2: memref<2x16x16xi8, #tpu.memory_space<vmem>>, %arg3: memref<2x16x16xf32, #tpu.memory_space<vmem>>) attributes {dimension_semantics = [#tpu.dimension_semantics<parallel>], iteration_bounds = array<i64: 1>, scalar_prefetch = 0 : i64, scratch_operands = 0 : i64, tpu.core_type = #tpu.core_type<tc>, window_params = [{transform_indices = @transform_0, window_bounds = array<i64: 2, 16, 16>}, {transform_indices = @transform_1, window_bounds = array<i64: 2, 16, 16>}, {transform_indices = @transform_2, window_bounds = array<i64: 2, 16, 16>}]} {
    %c0 = arith.constant 0 : index
    %c0_0 = arith.constant 0 : index
    %c0_1 = arith.constant 0 : index
    %0 = vector.load %arg1[%c0, %c0_0, %c0_1] : memref<2x16x16xf32, #tpu.memory_space<vmem>>, vector<2x16x16xf32>
    %c0_2 = arith.constant 0 : index
    %c0_3 = arith.constant 0 : index
    %c0_4 = arith.constant 0 : index
    %1 = vector.load %arg2[%c0_2, %c0_3, %c0_4] : memref<2x16x16xi8, #tpu.memory_space<vmem>>, vector<2x16x16xi8>
    %c0_i8 = arith.constant 0 : i8
    %2 = vector.broadcast %c0_i8 : i8 to vector<2x16x16xi8>
    %3 = arith.cmpi ne, %1, %2 : vector<2x16x16xi8>
    %cst = arith.constant 0.000000e+00 : f32
    %4 = vector.broadcast %cst : f32 to vector<2x16x16xf32>
    %5 = arith.select %3, %0, %4 : vector<2x16x16xi1>, vector<2x16x16xf32>
    %c0_5 = arith.constant 0 : index
    %c0_6 = arith.constant 0 : index
    %c0_7 = arith.constant 0 : index
    %6 = vector.load %arg3[%c0_5, %c0_6, %c0_7] : memref<2x16x16xf32, #tpu.memory_space<vmem>>, vector<2x16x16xf32>
    tpu.vector_store %arg3[%c0_5, %c0_6, %c0_7], %5 {strides = array<i32>} : memref<2x16x16xf32, #tpu.memory_space<vmem>>, vector<2x16x16xf32>,
    return
  }
  func.func @transform_0(%arg0: i32) -> (i32, i32, i32) {
    %c0_i32 = arith.constant 0 : i32
    %c0_i32_0 = arith.constant 0 : i32
    %c0_i32_1 = arith.constant 0 : i32
    return %arg0, %c0_i32, %c0_i32_0 : i32, i32, i32
  }
  func.func @transform_1(%arg0: i32) -> (i32, i32, i32) {
    %c0_i32 = arith.constant 0 : i32
    %c0_i32_0 = arith.constant 0 : i32
    %c0_i32_1 = arith.constant 0 : i32
    return %arg0, %c0_i32, %c0_i32_0 : i32, i32, i32
  }
  func.func @transform_2(%arg0: i32) -> (i32, i32, i32) {
    %c0_i32 = arith.constant 0 : i32
    %c0_i32_0 = arith.constant 0 : i32
    %c0_i32_1 = arith.constant 0 : i32
    return %arg0, %c0_i32, %c0_i32_0 : i32, i32, i32
  }
}

</mosaic_0001>

<bundles_post_ra>
// kernel: tpu_custom_call.1
= control target key start
LH: loop header
LB: loop body
LE: loop exit
PB: predicated region body
PF: predicated region fallthrough
CT: control target
= control target key end

     0   :  { %7 = vsyncpa [#allocation3], 0  ;;  %s242_s0 = inlined_call_operand.hbm [shape: f32[2,16,16], index: 0, kind: input, shape index: {}]   ;;  %s243_s1 = inlined_call_operand.hbm [shape: s8[2,16,16], index: 1, kind: input, shape index: {}]   ;;  %s244_s2 = inlined_call_operand.hbm [shape: f32[2,16,16], index: 2, kind: output, shape index: {}]  }
   0x1   :  { %8 = vsyncpa [#allocation6], 0 }
   0x2   :  { %9 = vsyncpa [#allocation4], 0  ;;  %s173_s9 = smov [#allocation2]   ;;  %s101_s13 = scalar_lea.hbm %s242_s0, 512 }
   0x3   :  { %s15_s10 = sshll.u32 %s173_s9, 4  ;;  %p102_p0 = scmp.ne.s32.totalorder %s242_s0, %s101_s13  ;;  %s16_s10 = int_to_ptr.vmem [resolvable:$true] %s15_s10 }
   0x4   :  { %p105_p1 = scmp.lt.u32.totalorder %s101_s13, %s242_s0 }
   0x6   :  { %p107_p2 = pnand %p105_p1, %p102_p0 }
   0x8   :  { %110 = shalt.err (!%p107_p2)
}
   0x9   :  { %s111_s18 = scalar_lea.vmem %s16_s10, 512  ;;  %p116_p4 = scmp.lt.s32.totalorder %s16_s10, %s16_s10 }
   0xa   :  { %p112_p3 = scmp.ne.s32.totalorder %s16_s10, %s111_s18  ;;  %p117_p5 = scmp.lt.s32.totalorder %s111_s18, %s111_s18 }
   0xc   :  { %p118_p6 = por %p117_p5, %p116_p4 }
   0xe   :  { %p119_p7 = pnand %p118_p6, %p112_p3 }
  0x10   :  { %122 = shalt.err (!%p119_p7)
}
  0x11   :  { %s174_s19 = smov 128   ;;  %s175_s20 = smov 8  }
  0x12   :  { %21 = dma.hbm_to_vmem [thread:$0]  %s242_s0, 512, %s16_s10, [#allocation3], %s174_s19, %s174_s19, %s175_s20  }
  0x13   :  { %s176_s23 = smov [#allocation5]   ;;  %s123_s27 = scalar_lea.hbm %s243_s1, 128 }
  0x14   :  { %s27_s24 = sshll.u32 %s176_s23, 4  ;;  %p124_p8 = scmp.ne.s32.totalorder %s243_s1, %s123_s27  ;;  %s28_s24 = int_to_ptr.vmem [resolvable:$true] %s27_s24 }
  0x15   :  { %p127_p9 = scmp.lt.u32.totalorder %s123_s27, %s243_s1 }
  0x17   :  { %p129_p10 = pnand %p127_p9, %p124_p8 }
  0x19   :  { %132 = shalt.err (!%p129_p10)
}
  0x1a   :  { %s133_s4 = scalar_lea.vmem %s28_s24, 128  ;;  %p138_p12 = scmp.lt.s32.totalorder %s28_s24, %s28_s24 }
  0x1b   :  { %p134_p11 = scmp.ne.s32.totalorder %s28_s24, %s133_s4  ;;  %p139_p13 = scmp.lt.s32.totalorder %s133_s4, %s133_s4 }
  0x1d   :  { %p140_p0 = por %p139_p13, %p138_p12 }
  0x1f   :  { %p141_p1 = pnand %p140_p0, %p134_p11 }
  0x21   :  { %144 = shalt.err (!%p141_p1)
}
  0x22   :  { %s177_s0 = smov 32   ;;  %s178_s5 = smov 2  }
  0x23   :  { %33 = dma.hbm_to_vmem [thread:$0]  %s243_s1, 128, %s28_s24, [#allocation6], %s177_s0, %s177_s0, %s178_s5  }
  0x24   :  { %167 = dma.done.wait [#allocation3], 512  }
  0x25   :  { %168 = vsyncadd [#allocation3], 4294966784 }
  0x26   :  { %169 = dma.done.wait [#allocation6], 128  }
  0x27   :  { %170 = vsyncadd [#allocation6], 4294967168  ;;  %v46_v0 = vld [vmem:[#allocation5] sm:$0x3]  ;;  %v47_v1 = vld [vmem:[#allocation5 + $0x2] sm:$0x3] }
  0x28   :  { %vm50_vm0 = vnez %v46_v0  ;;  %v48_v2 = vld [vmem:[#allocation5 + $0x4] sm:$0x3]  ;;  %v179_v3 = vmov 0   ;;  %vm51_vm1 = vnez %v47_v1  ;;  %v49_v5 = vld [vmem:[#allocation5 + $0x6] sm:$0x3]  ;;  %vm70_vm4 = vcmask 130048  }
  0x29   :  { %v54_v4 = vsel %vm50_vm0, 16843009, %v179_v3  ;;  %vm52_vm2 = vnez %v48_v2  ;;  %v42_v6 = vld [vmem:[#allocation2] sm:$0xff]  ;;  %v55_v8 = vsel %vm51_vm1, 16843009, %v179_v3  ;;  %vm53_vm3 = vnez %v49_v5  ;;  %v43_v10 = vld [vmem:[#allocation2 + $0x8] sm:$0xff] }
  0x2a   :  { %v58_v7 = vunpack.c.0.s8 %v54_v4  ;;  %v56_v9 = vsel %vm52_vm2, 16843009, %v179_v3  ;;  %v59_v11 = vunpack.c.0.s8 %v55_v8  ;;  %v44_v12 = vld [vmem:[#allocation2 + $0x10] sm:$0xff]  ;;  %v57_v14 = vsel %vm53_vm3, 16843009, %v179_v3  ;;  %s180_s1 = smov [#allocation7]  }
  0x2b   :  { %v60_v13 = vunpack.c.0.s8 %v56_v9  ;;  %s80_s8 = sshll.u32 %s180_s1, 4  ;;  %v45_v15 = vld [vmem:[#allocation2 + $0x18] sm:$0xff]  ;;  %v61_v16 = vunpack.c.0.s8 %v57_v14  ;;  %s81_s8 = int_to_ptr.vmem [resolvable:$true] %s80_s8 }
  0x2c   :  { %vm62_vm5 = vcmp.ne.s32.totalorder %v58_v7, 0  ;;  %vm63_vm6 = vcmp.ne.s32.totalorder %v59_v11, 0  ;;  %s145_s9 = scalar_lea.vmem %s81_s8, 512  ;;  %p150_p3 = scmp.lt.s32.totalorder %s81_s8, %s81_s8 }
  0x2d   :  { %v66_v17 = vsel %vm62_vm5, %v42_v6, 0.0  ;;  %vm64_vm7 = vcmp.ne.s32.totalorder %v60_v13, 0  ;;  %v67_v18 = vsel %vm63_vm6, %v43_v10, 0.0  ;;  %vm65_vm8 = vcmp.ne.s32.totalorder %v61_v16, 0  ;;  %p146_p2 = scmp.ne.s32.totalorder %s81_s8, %s145_s9  ;;  %p151_p4 = scmp.lt.s32.totalorder %s145_s9, %s145_s9 }
  0x2e   :  { %71 = vst.msk [vmem:[#allocation7] sm:$0xff] %vm70_vm4, %v66_v17  ;;  %v68_v19 = vsel %vm64_vm7, %v44_v12, 0.0  ;;  %72 = vst.msk [vmem:[#allocation7 + $0x8] sm:$0xff] %vm70_vm4, %v67_v18  ;;  %v69_v20 = vsel %vm65_vm8, %v45_v15, 0.0 }
  0x2f   :  { %73 = vst.msk [vmem:[#allocation7 + $0x10] sm:$0xff] %vm70_vm4, %v68_v19  ;;  %74 = vst.msk [vmem:[#allocation7 + $0x18] sm:$0xff] %vm70_vm4, %v69_v20  ;;  %p152_p5 = por %p151_p4, %p150_p3 }
  0x31   :  { %p153_p6 = pnand %p152_p5, %p146_p2 }
  0x33   :  { %156 = shalt.err (!%p153_p6)
}
  0x34   :  { %s157_s12 = scalar_lea.hbm %s244_s2, 512 }
  0x35   :  { %p158_p7 = scmp.ne.s32.totalorder %s244_s2, %s157_s12  ;;  %p161_p8 = scmp.lt.u32.totalorder %s157_s12, %s244_s2 }
  0x37   :  { %p163_p9 = pnand %p161_p8, %p158_p7 }
  0x39   :  { %166 = shalt.err (!%p163_p9)
}
  0x3a   :  { %86 = dma.vmem_to_hbm [thread:$0]  %s81_s8, 512, %s244_s2, [#allocation4], %s174_s19, %s174_s19, %s175_s20  }
  0x3b   :  { %171 = dma.done.wait [#allocation4], 512  }
  0x3c   :  { %172 = vsyncadd [#allocation4], 4294966784 }
  0x3d   :  { %90 = vsyncpa [#allocation3], 1 }
  0x3e   :  { %91 = vsyncpa [#allocation6], 1 }
  0x3f   :  { %92 = vsyncpa [#allocation4], 1 }

</bundles_post_ra>
